<compile_context>
chip_gen: v7x
topology: tpu7x:2x2x1
jax: 0.10.0
libtpu: 0.0.40
codegen_flags: <defaults>
</compile_context>

<pallas_src>
import jax
import jax.numpy as jnp
from jax.experimental import pallas as pl
from jax.experimental.pallas import tpu as pltpu


def _round_up(x, m):
    return (x + m - 1) // m * m


def clip_classifier_kernel(x_ref, w_enc_ref, w_cls_ref, b_cls_ref,
                           out_ref, acc_ref):
    """One (batch-tile, K-tile) grid step.

    x_ref     : (TM, TK)        float32   raw image tile (cast to bf16 in-kernel)
    w_enc_ref : (TK, D_PAD)     bfloat16  encode_image stand-in projection tile
    w_cls_ref : (D_PAD, N_PAD)  bfloat16  classifier weight (zero-padded lanes)
    b_cls_ref : (1, N_PAD)      float32   classifier bias (zero-padded lanes)
    out_ref   : (TM, N_PAD)     float32   lane-dense logits slab (sliced in wrapper)
    acc_ref   : (TM, D_PAD)     float32   VMEM accumulator for image features
    """
    k = pl.program_id(1)

    @pl.when(k == 0)
    def _():
        acc_ref[...] = jnp.zeros_like(acc_ref)

    # autocast-style matmul: narrow operands straight into the MXU, f32 acc.
    x = x_ref[...].astype(jnp.bfloat16)
    acc_ref[...] += jnp.dot(x, w_enc_ref[...],
                            preferred_element_type=jnp.float32)

    @pl.when(k == pl.num_programs(1) - 1)
    def _():
        # encode_image returns half-precision features: one narrowing cast,
        # which also feeds the second MXU op at native narrow-precision rate.
        # (bf16 stands in for torch fp16 -- same autocast-level precision.)
        feats = acc_ref[...].astype(jnp.bfloat16)
        logits = jnp.dot(feats, w_cls_ref[...],
                         preferred_element_type=jnp.float32)
        # `output.float()`: keep the result in f32; bias added in f32.
        out_ref[...] = logits + b_cls_ref[...]


def clip_classifier_forward(image, w_enc, w_cls, b_cls):
    """image: (B, C, H, W) float; w_enc: (K, D); w_cls: (D, n_cls); b_cls: (n_cls,)."""
    B = image.shape[0]
    K, D = w_enc.shape
    num_classes = w_cls.shape[1]

    # ---- padded / tiled problem sizes -------------------------------------
    B_pad = _round_up(B, 8)
    K_pad = _round_up(K, 128)
    D_pad = _round_up(D, 128)
    N_pad = _round_up(num_classes, 128)         # lane-dense output slab

    TM = B_pad if B_pad <= 128 else 128          # batch tile ("parallel" axis)
    if B_pad % TM:
        TM = 8
    # K tile: biggest candidate that divides K_pad while keeping the
    # double-buffered x + w_enc tiles well inside every generation's scoped
    # VMEM budget (v7x: 64 MiB physical / 32 MiB default scoped).
    TK = 128
    for cand in (2048, 1024, 512, 256, 128):
        tile_bytes = 2 * (TM * cand * 4 + cand * D_pad * 2)
        if K_pad % cand == 0 and tile_bytes <= 16 * 1024 * 1024:
            TK = cand
            break

    # ---- one-time plumbing (no half-precision copy of the image) ----------
    x = image.reshape(B, K).astype(jnp.float32)
    if B_pad != B or K_pad != K:
        x = jnp.pad(x, ((0, B_pad - B), (0, K_pad - K)))
    w_enc_p = jnp.pad(w_enc.astype(jnp.bfloat16),
                      ((0, K_pad - K), (0, D_pad - D)))
    w_cls_p = jnp.pad(w_cls.astype(jnp.bfloat16),
                      ((0, D_pad - D), (0, N_pad - num_classes)))
    b_cls_p = jnp.pad(b_cls.astype(jnp.float32),
                      (0, N_pad - num_classes)).reshape(1, N_pad)

    grid = (B_pad // TM, K_pad // TK)            # reduction axis last

    grid_spec = pltpu.PrefetchScalarGridSpec(
        num_scalar_prefetch=0,
        grid=grid,
        in_specs=[
            pl.BlockSpec((TM, TK), lambda b, k: (b, k)),        # image tile
            pl.BlockSpec((TK, D_pad), lambda b, k: (k, 0)),     # w_enc tile
            pl.BlockSpec((D_pad, N_pad), lambda b, k: (0, 0)),  # w_cls (resident)
            pl.BlockSpec((1, N_pad), lambda b, k: (0, 0)),      # bias (resident)
        ],
        out_specs=pl.BlockSpec((TM, N_pad), lambda b, k: (b, 0)),
        scratch_shapes=[pltpu.VMEM((TM, D_pad), jnp.float32)],
    )

    out_padded = pl.pallas_call(
        clip_classifier_kernel,
        out_shape=jax.ShapeDtypeStruct((B_pad, N_pad), jnp.float32),
        grid_spec=grid_spec,
        compiler_params=pltpu.CompilerParams(
            dimension_semantics=("parallel", "arbitrary"),
            vmem_limit_bytes=32 * 1024 * 1024,
        ),
    )(x, w_enc_p, w_cls_p, b_cls_p)

    return out_padded[:B, :num_classes]


if __name__ == "__main__":
    # Small synthetic shapes consistent with the forward pass:
    #   image (B, C, H, W), CLIP visual output_dim D, 2-way classifier.
    B, C, H, W = 2, 3, 16, 16
    K = C * H * W          # 768 (flattened image -> encode stand-in input)
    D = 32                 # clip_model.visual.output_dim (synthetic)
    NUM_CLASSES = 2

    key = jax.random.PRNGKey(0)
    k_img, k_enc, k_w, k_b = jax.random.split(key, 4)

    image = jax.random.normal(k_img, (B, C, H, W), dtype=jnp.float32)

    # Deterministic synthetic parameters (frozen CLIP stand-in + half classifier).
    w_enc = (jax.random.normal(k_enc, (K, D), dtype=jnp.float32) * 0.02).astype(
        jnp.float16
    )
    # nn.Linear(D, 2).half(): weight (2, D) in torch; store as (D, 2) for x @ W.
    w_cls = (jax.random.normal(k_w, (D, NUM_CLASSES), dtype=jnp.float32) * 0.1).astype(
        jnp.float16
    )
    b_cls = (jax.random.normal(k_b, (NUM_CLASSES,), dtype=jnp.float32) * 0.1).astype(
        jnp.float16
    )

    out = clip_classifier_forward(image, w_enc, w_cls, b_cls)
    out = jax.block_until_ready(out)

    assert out.shape == (B, NUM_CLASSES)
    assert out.dtype == jnp.float32

    # Loose reference check (autocast-level tolerance for the narrow matmuls).
    x_ref = image.reshape(B, K).astype(jnp.float32)
    feats_ref = x_ref @ w_enc.astype(jnp.float32)
    ref = feats_ref @ w_cls.astype(jnp.float32) + b_cls.astype(jnp.float32)
    assert bool(jnp.all(jnp.isfinite(out)))
    assert bool(jnp.allclose(out, ref, atol=5e-2, rtol=5e-2))

    print("KERNEL_OK")
</pallas_src>

<mosaic_0001>
module attributes {stable_mosaic.version = 11 : i64} {
  func.func @clip_classifier_kernel(%arg0: i32, %arg1: i32, %arg2: memref<8x256xf32, #tpu.memory_space<vmem>>, %arg3: memref<256x128xbf16, #tpu.memory_space<vmem>>, %arg4: memref<128x128xbf16, #tpu.memory_space<vmem>>, %arg5: memref<1x128xf32, #tpu.memory_space<vmem>>, %arg6: memref<8x128xf32, #tpu.memory_space<vmem>>, %arg7: memref<8x128xf32, #tpu.memory_space<vmem>>) attributes {dimension_semantics = [#tpu.dimension_semantics<parallel>, #tpu.dimension_semantics<arbitrary>], iteration_bounds = array<i64: 1, 3>, scalar_prefetch = 0 : i64, scratch_operands = 1 : i64, tpu.core_type = #tpu.core_type<tc>, window_params = [{transform_indices = @transform_0, window_bounds = array<i64: 8, 256>}, {transform_indices = @transform_1, window_bounds = array<i64: 256, 128>}, {pipeline_mode = #tpu.pipeline_mode<synchronous>, transform_indices = @transform_2, window_bounds = array<i64: 128, 128>}, {pipeline_mode = #tpu.pipeline_mode<synchronous>, transform_indices = @transform_3, window_bounds = array<i64: 1, 128>}, {transform_indices = @transform_4, window_bounds = array<i64: 8, 128>}]} {
    %c0_i32 = arith.constant 0 : i32
    %0 = arith.cmpi eq, %arg1, %c0_i32 : i32
    %1 = arith.extui %0 : i1 to i32
    %c0_i32_0 = arith.constant 0 : i32
    %2 = arith.cmpi ne, %1, %c0_i32_0 : i32
    scf.if %2 {
      %cst_9 = arith.constant 0.000000e+00 : f32
      %13 = vector.broadcast %cst_9 : f32 to vector<8x128xf32>
      %c0_10 = arith.constant 0 : index
      %c0_11 = arith.constant 0 : index
      %14 = vector.load %arg7[%c0_10, %c0_11] : memref<8x128xf32, #tpu.memory_space<vmem>>, vector<8x128xf32>
      tpu.vector_store %arg7[%c0_10, %c0_11], %13 {strides = array<i32>} : memref<8x128xf32, #tpu.memory_space<vmem>>, vector<8x128xf32>,
    } else {
    }
    %c0 = arith.constant 0 : index
    %c0_1 = arith.constant 0 : index
    %3 = vector.load %arg2[%c0, %c0_1] : memref<8x256xf32, #tpu.memory_space<vmem>>, vector<8x256xf32>
    %4 = arith.truncf %3 : vector<8x256xf32> to vector<8x256xbf16>
    %c0_2 = arith.constant 0 : index
    %c0_3 = arith.constant 0 : index
    %5 = vector.load %arg7[%c0_2, %c0_3] : memref<8x128xf32, #tpu.memory_space<vmem>>, vector<8x128xf32>
    %c0_4 = arith.constant 0 : index
    %c0_5 = arith.constant 0 : index
    %6 = vector.load %arg3[%c0_4, %c0_5] : memref<256x128xbf16, #tpu.memory_space<vmem>>, vector<256x128xbf16>
    %cst = arith.constant dense<0.000000e+00> : vector<8x128xf32>
    %7 = tpu.matmul %4, %6, %cst {dimension_numbers = #tpu.dot_dimension_numbers<[1], [0], [0], [1], [0, 0, 1, 1], [], []>} : vector<8x256xbf16>, vector<256x128xbf16>, vector<8x128xf32> -> vector<8x128xf32>
    %8 = arith.addf %5, %7 : vector<8x128xf32>
    %c0_6 = arith.constant 0 : index
    %c0_7 = arith.constant 0 : index
    %9 = vector.load %arg7[%c0_6, %c0_7] : memref<8x128xf32, #tpu.memory_space<vmem>>, vector<8x128xf32>
    tpu.vector_store %arg7[%c0_6, %c0_7], %8 {strides = array<i32>} : memref<8x128xf32, #tpu.memory_space<vmem>>, vector<8x128xf32>,
    %c2_i32 = arith.constant 2 : i32
    %10 = arith.cmpi eq, %arg1, %c2_i32 : i32
    %11 = arith.extui %10 : i1 to i32
    %c0_i32_8 = arith.constant 0 : i32
    %12 = arith.cmpi ne, %11, %c0_i32_8 : i32
    scf.if %12 {
      %c0_9 = arith.constant 0 : index
      %c0_10 = arith.constant 0 : index
      %13 = vector.load %arg7[%c0_9, %c0_10] : memref<8x128xf32, #tpu.memory_space<vmem>>, vector<8x128xf32>
      %14 = arith.truncf %13 : vector<8x128xf32> to vector<8x128xbf16>
      %c0_11 = arith.constant 0 : index
      %c0_12 = arith.constant 0 : index
      %15 = vector.load %arg4[%c0_11, %c0_12] : memref<128x128xbf16, #tpu.memory_space<vmem>>, vector<128x128xbf16>
      %cst_13 = arith.constant dense<0.000000e+00> : vector<8x128xf32>
      %16 = tpu.matmul %14, %15, %cst_13 {dimension_numbers = #tpu.dot_dimension_numbers<[1], [0], [0], [1], [0, 0, 1, 1], [], []>} : vector<8x128xbf16>, vector<128x128xbf16>, vector<8x128xf32> -> vector<8x128xf32>
      %c0_14 = arith.constant 0 : index
      %c0_15 = arith.constant 0 : index
      %17 = vector.load %arg5[%c0_14, %c0_15] : memref<1x128xf32, #tpu.memory_space<vmem>>, vector<1x128xf32>
      %18 = vector.broadcast %17 : vector<1x128xf32> to vector<8x128xf32>
      %19 = arith.addf %16, %18 : vector<8x128xf32>
      %c0_16 = arith.constant 0 : index
      %c0_17 = arith.constant 0 : index
      %20 = vector.load %arg6[%c0_16, %c0_17] : memref<8x128xf32, #tpu.memory_space<vmem>>, vector<8x128xf32>
      tpu.vector_store %arg6[%c0_16, %c0_17], %19 {strides = array<i32>} : memref<8x128xf32, #tpu.memory_space<vmem>>, vector<8x128xf32>,
    } else {
    }
    return
  }
  func.func @transform_0(%arg0: i32, %arg1: i32) -> (i32, i32) {
    %c0_i32 = arith.constant 0 : i32
    return %arg0, %arg1 : i32, i32
  }
  func.func @transform_1(%arg0: i32, %arg1: i32) -> (i32, i32) {
    %c0_i32 = arith.constant 0 : i32
    %c0_i32_0 = arith.constant 0 : i32
    return %arg1, %c0_i32 : i32, i32
  }
  func.func @transform_2(%arg0: i32, %arg1: i32) -> (i32, i32) {
    %c0_i32 = arith.constant 0 : i32
    %c0_i32_0 = arith.constant 0 : i32
    %c0_i32_1 = arith.constant 0 : i32
    return %c0_i32, %c0_i32_0 : i32, i32
  }
  func.func @transform_3(%arg0: i32, %arg1: i32) -> (i32, i32) {
    %c0_i32 = arith.constant 0 : i32
    %c0_i32_0 = arith.constant 0 : i32
    %c0_i32_1 = arith.constant 0 : i32
    return %c0_i32, %c0_i32_0 : i32, i32
  }
  func.func @transform_4(%arg0: i32, %arg1: i32) -> (i32, i32) {
    %c0_i32 = arith.constant 0 : i32
    %c0_i32_0 = arith.constant 0 : i32
    return %arg0, %c0_i32 : i32, i32
  }
}

</mosaic_0001>

<bundles_post_ra>
// kernel: tpu_custom_call.1
= control target key start
LH: loop header
LB: loop body
LE: loop exit
PB: predicated region body
PF: predicated region fallthrough
CT: control target
= control target key end

     0   :  { %9 = vsyncpa [#allocation4], 0  ;;  %s1352_s0 = inlined_call_operand.hbm [shape: f32[8,768], index: 0, kind: input, shape index: {}]   ;;  %s1353_s1 = inlined_call_operand.hbm [shape: bf16[768,128], index: 1, kind: input, shape index: {}]   ;;  %s1354_s2 = inlined_call_operand.hbm [shape: bf16[128,128], index: 2, kind: input, shape index: {}]   ;;  %s1355_s3 = inlined_call_operand.vmem [shape: f32[1,128], index: 3, kind: input, shape index: {}]   ;;  %s1356_s4 = inlined_call_operand.hbm [shape: f32[8,128], index: 4, kind: output, shape index: {}]  }
   0x1   :  { %11 = vsyncpa [#allocation4 + $0x1], 0 }
   0x2   :  { %12 = vsyncpa [#allocation7], 0 }
   0x3   :  { %14 = vsyncpa [#allocation7 + $0x1], 0 }
   0x4   :  { %15 = vsyncpa [#allocation5], 0  ;;  %s1100_s15 = smov 0   ;;  %s1102_s16 = smov 0  }
   0x5   :  { %s1104_s17 = smov 0   ;;  %s1106_s18 = smov 0  }
   0x6   :  { %s1108_s19 = smov 0   ;;  %s1110_s20 = smov 0  }
   0x7 LB: > { %s1129_s21 = sadd.s32 4294967295, %s1064_s20   ;;  %p55_p0 = scmp.ne.s32.totalorder %s1048_s16, %s1044_s15  ;;  %s1064_s20 = sphi %s1110_s20, %s21_s20   ;;  %s1060_s19 = sphi %s1108_s19, %s1374_s19   ;;  %s1056_s18 = sphi %s1106_s18, %s1373_s18   ;;  %s1052_s17 = sphi %s1104_s17, %s1372_s17   ;;  %s1048_s16 = sphi %s1102_s16, %s1371_s16   ;;  %s1044_s15 = sphi %s1100_s15, %s1370_s15  }
   0x8   : > { %p1357_p1 = scmp.eq.s32.totalorder %s1129_s21, 0  ;;  %p684_p2 = scmp.ge.s32.totalorder %s1064_s20, 1 }
   0x9   : > { %p160_p3 = scmp.lt.s32.totalorder %s1064_s20, 4  ;;  %s1066_s24 = smov [#allocation8]  }
   0xa   : > { %p1137_p4 = por %p1357_p1, %p55_p0  ;;  %s172_s25 = sshll.u32 %s1066_s24, 4  ;;  %s173_s25 = int_to_ptr.vmem [resolvable:$true] %s172_s25 }
   0xb   : > { %p1141_p5 = pnand %p684_p2, %p160_p3  ;;  %s30_s27 = sadd.s32 1, %s1060_s19 }
   0xc   : > { %s1361_s22 = scalar_select %p1137_p4, 1, 0 }
   0xd   : > { %s1362_s23 = scalar_select %p1141_p5, 1, 0 }
   0xe   : > { %p793_p6 = pneg %p1141_p5  ;;  %s888_s30 = scalar_lea.hbm %s1354_s2, 1024 }
   0xf   : > { %p889_p8 = scmp.ne.s32.totalorder %s1354_s2, %s888_s30  ;;  %p895_p12 = scmp.lt.u32.totalorder %s888_s30, %s1354_s2 }
  0x10   : > { %p1149_p7 = pnand %p793_p6, %p1357_p1 }
  0x12   : > { %p890_p9 = pneg %p1149_p7 }
  0x14   : > { %p891_p10 = pnand %p890_p9, %p889_p8 }
  0x16   : > { %p892_p11 = pneg %p891_p10 }
  0x18   : > { %p897_p13 = pnand %p895_p12, %p892_p11 }
  0x1a   : > { %900 = shalt.err (!%p897_p13)
}
  0x1b   : > { %s901_s9 = scalar_lea.vmem %s173_s25, 1024  ;;  %p909_p6 = scmp.lt.s32.totalorder %s173_s25, %s173_s25 }
  0x1c   : > { %p902_p0 = scmp.ne.s32.totalorder %s173_s25, %s901_s9  ;;  %p910_p1 = scmp.lt.s32.totalorder %s901_s9, %s901_s9 }
  0x1e   : > { %p904_p2 = pnand %p902_p0, %p890_p9  ;;  %p911_p4 = por %p910_p1, %p909_p6 }
  0x20   : > { %p905_p3 = pneg %p904_p2 }
  0x22   : > { %p912_p5 = pnand %p911_p4, %p905_p3 }
  0x24   : > { %915 = shalt.err (!%p912_p5)
}
  0x25   : > { %s1360_s10 = smov 64   ;;  %s1068_s11 = smov 4  }
  0x26   : > { %796 = dma.hbm_to_vmem [thread:$0]  (!%p1149_p7), %s1354_s2, 1024, %s173_s25, [#allocation7], %s1360_s10, %s1360_s10, %s1068_s11  }
  0x27   : > { %p31_p1 = scmp.ge.s32.totalorder %s30_s27, 3  ;;  %s42_s14 = sadd.s32 1, %s1052_s17 }
  0x28   : > { %p49_p4 = scmp.ne.s32.totalorder %s1052_s17, %s1048_s16  ;;  %p50_p5 = scmp.eq.s32.totalorder %s1064_s20, 0 }
  0x29   : > { %s1376_s27 = smov (%p31_p1, %s30_s27), 0  ;;  %p805_p9 = scmp.lt.s32.totalorder %s1064_s20, 3 }
  0x2a   : > { %p51_p8 = por %p50_p5, %p49_p4  ;;  %s38_s15 = ssub.s32 %s1060_s19, %s1376_s27 }
  0x2b   : > { %s1183_s24 = sand.u32 1, %s1052_s17   ;;  %p40_p10 = scmp.eq.s32.totalorder %s38_s15, 0 }
  0x2c   : > { %s687_s26 = sshll.u32 %s1183_s24, 4  ;;  %s728_s28 = sshll.u32 %s1060_s19, 8 }
  0x2d   : > { %s1188_s29 = scalar_select %p40_p10, %s1052_s17, %s42_s14  }
  0x2e   : > { %s1193_s5 = scalar_lea.hbm %s1352_s0, %s728_s28  ;;  %s193_s6 = scalar_lea.vmem [#allocation3], %s687_s26 }
  0x2f   : > { %s203_s7 = sshll.u32 %s193_s6, 4  ;;  %p1195_p7 = pnand %p805_p9, %p51_p8  ;;  %s1199_s7 = int_to_ptr.vmem [resolvable:$true] %s203_s7 }
  0x30   : > { %s690_s9 = sshll.u32 %s1183_s24, 7  ;;  %s190_s12 = scalar_lea.sflag [#allocation4], %s1183_s24 }
  0x31   : > { %s916_s13 = scalar_lea.hbm %s1193_s5, 256  ;;  %p918_p12 = pneg %p1195_p7 }
  0x32   : > { %p917_p11 = scmp.ne.s32.totalorder %s1193_s5, %s916_s13  ;;  %s921_s26 = scalar_lea.hbm %s1352_s0, 768 }
  0x33   : > { %p922_p2 = scmp.lt.u32.totalorder %s1193_s5, %s1352_s0  ;;  %p923_p3 = scmp.lt.u32.totalorder %s921_s26, %s916_s13 }
  0x34   : > { %p919_p13 = pnand %p918_p12, %p917_p11  ;;  %p925_p1 = scmp.lt.u32.totalorder %s916_s13, %s1193_s5 }
  0x35   : > { %p924_p6 = por %p923_p3, %p922_p2 }
  0x36   : > { %p920_p0 = pneg %p919_p13 }
  0x37   : > { %p926_p4 = por %p925_p1, %p924_p6 }
  0x39   : > { %p927_p5 = pnand %p926_p4, %p920_p0 }
  0x3b   : > { %930 = shalt.err (!%p927_p5)
}
  0x3c   : > { %s931_s30 = scalar_lea.vmem %s1199_s7, 256  ;;  %s1069_s6 = smov [#allocation3]  }
  0x3d   : > { %p932_p8 = scmp.ne.s32.totalorder %s1199_s7, %s931_s30  ;;  %s936_s14 = sshll.u32 %s1069_s6, 4  ;;  %s937_s14 = int_to_ptr.vmem [resolvable:$false] %s936_s14 }
  0x3e   : > { %s938_s15 = scalar_lea.vmem %s937_s14, 512  ;;  %p939_p11 = scmp.lt.s32.totalorder %s1199_s7, %s937_s14 }
  0x3f   : > { %p934_p9 = pnand %p932_p8, %p918_p12  ;;  %p940_p13 = scmp.lt.s32.totalorder %s938_s15, %s931_s30 }
  0x41   : > { %p935_p10 = pneg %p934_p9  ;;  %p941_p2 = por %p940_p13, %p939_p11 }
  0x43   : > { %p942_p3 = pnand %p941_p2, %p935_p10 }
  0x45   : > { %945 = shalt.err (!%p942_p3)
}
  0x46   : > { %800 = dma.hbm_to_vmem [thread:$0]  (!%p1195_p7), %s1193_s5, 256, %s1199_s7, %s190_s12  }
  0x47   : > { %s729_s13 = sshll.u32 %s1060_s19, 11  ;;  %s214_s26 = scalar_lea.vmem [#allocation6], %s690_s9 }
  0x48   : > { %s221_s28 = sshll.u32 %s214_s26, 4  ;;  %s210_s25 = sand.u32 1, %s1064_s20   ;;  %s1231_s28 = int_to_ptr.vmem [resolvable:$true] %s221_s28 }
  0x49   : > { %s1237_s14 = scalar_lea.hbm %s1353_s1, %s729_s13  ;;  %s1239_s15 = scalar_lea.sflag [#allocation7], %s210_s25 }
  0x4a   : > { %s946_s10 = scalar_lea.hbm %s1237_s14, 2048  ;;  %s951_s7 = scalar_lea.hbm %s1353_s1, 6144 }
  0x4b   : > { %p947_p0 = scmp.ne.s32.totalorder %s1237_s14, %s946_s10  ;;  %p952_p4 = scmp.lt.u32.totalorder %s1237_s14, %s1353_s1 }
  0x4c   : > { %p953_p5 = scmp.lt.u32.totalorder %s951_s7, %s946_s10  ;;  %p955_p9 = scmp.lt.u32.totalorder %s946_s10, %s1237_s14 }
  0x4d   : > { %p949_p6 = pnand %p947_p0, %p918_p12 }
  0x4e   : > { %p954_p8 = por %p953_p5, %p952_p4 }
  0x4f   : > { %p950_p1 = pneg %p949_p6 }
  0x50   : > { %p956_p10 = por %p955_p9, %p954_p8 }
  0x52   : > { %p957_p11 = pnand %p956_p10, %p950_p1 }
  0x54   : > { %960 = shalt.err (!%p957_p11)
}
  0x55   : > { %s961_s13 = scalar_lea.vmem %s1231_s28, 2048  ;;  %s1070_s26 = smov [#allocation6]  }
  0x56   : > { %p962_p13 = scmp.ne.s32.totalorder %s1231_s28, %s961_s13  ;;  %s966_s25 = sshll.u32 %s1070_s26, 4  ;;  %s967_s25 = int_to_ptr.vmem [resolvable:$false] %s966_s25 }
  0x57   : > { %s968_s30 = scalar_lea.vmem %s967_s25, 4096  ;;  %p969_p0 = scmp.lt.s32.totalorder %s1231_s28, %s967_s25 }
  0x58   : > { %p964_p2 = pnand %p962_p13, %p918_p12  ;;  %p970_p6 = scmp.lt.s32.totalorder %s968_s30, %s961_s13 }
  0x5a   : > { %p965_p3 = pneg %p964_p2  ;;  %p971_p4 = por %p970_p6, %p969_p0 }
  0x5c   : > { %p972_p5 = pnand %p971_p4, %p965_p3 }
  0x5e   : > { %975 = shalt.err (!%p972_p5)
}
  0x5f   : > { %s1365_s10 = smov 64   ;;  %p1366_p12 = scmp.ne.s32.totalorder %s1362_s23, 0 }
  0x60   : > { %803 = dma.hbm_to_vmem [thread:$0]  (!%p1195_p7), %s1237_s14, 2048, %s1231_s28, %s1239_s15, %s1365_s10, %s1365_s10, %s1068_s11  }
  0x61   : > { %233 = sbr.rel (%p1366_p12) target bundleno = 620 (0x26c), region = 36  ;;  %s235_s6 = sand.u32 (!%p1366_p12), 1, %s1048_s16  }
  0x62   : > { %s694_s24 = sshll.u32 (!%p1366_p12), %s235_s6, 4  ;;  %s236_s5 = scalar_lea.sflag (!%p1366_p12), [#allocation4], %s235_s6 }
  0x63   : > { %s1271_s7 = scalar_lea.vmem (!%p1366_p12), [#allocation3], %s694_s24  ;;  %p1367_p1 = scmp.ne.s32.totalorder (!%p1366_p12), %s1361_s22, 0 }
  0x68   : > { %1027 = dma.done.wait (%p1367_p1), %s236_s5, 256  }
  0x69   : > { %1029 = vsyncadd (%p1367_p1), %s236_s5, 4294967040  ;;  %s244_s8 = sand.u32 1, %s1129_s21   ;;  %s695_s9 = sshll.u32 %s235_s6, 7 }
  0x6a   : > { %s245_s11 = scalar_lea.sflag [#allocation7], %s244_s8  ;;  %s1278_s28 = scalar_lea.vmem [#allocation6], %s695_s9 }
  0x6b   : > { %1031 = dma.done.wait (%p1367_p1), %s245_s11, 2048  }
  0x6c   : > { %1033 = vsyncadd (%p1367_p1), %s245_s11, 4294965248  ;;  %p1368_p7 = scmp.eq.s32.totalorder %s1129_s21, 0 }
  0x6e   : > { %1035 = dma.done.wait (%p1368_p7), [#allocation7], 1024   ;;  %p1369_p8 = pmov %p1368_p7 }
  0x6f   : > { %p697_p9 = scmp.ne.s32.totalorder %s1056_s18, 0 }
  0x70   : > { %1037 = vsyncadd (%p1369_p8), [#allocation7], 4294966272  ;;  %v1071_v0 = vmov (!%p697_p9), 0.0  }
  0x71   : > { %283 = sbr.rel (%p697_p9) target bundleno = 120 (0x78), region = 52  ;;  %284 = vst [vmem:[#allocation2] sm:$0xff] (!%p697_p9), %v1071_v0 }
  0x78 PF: > { %v864_v1 = vld [vmem:[%s1278_s28 + $0x40] sm:$0xff]   ;;  %v866_v3 = vld [vmem:[%s1278_s28 + $0x48] sm:$0xff]   ;;  %v868_v5 = vld [vmem:[%s1278_s28 + $0x50] sm:$0xff]   ;;  %p714_p10 = scmp.ne.s32.totalorder %s1056_s18, 2 }
  0x79   : > { %v865_v2 = vld [vmem:[%s1278_s28] sm:$0xff]   ;;  %730 = vmatprep.subr.bf16.mxu0 %v864_v1  ;;  %v867_v4 = vld [vmem:[%s1278_s28 + $0x8] sm:$0xff]   ;;  %v869_v6 = vld [vmem:[%s1278_s28 + $0x10] sm:$0xff]   ;;  %v1072_v29 = vmov (!%p714_p10), 0.0   ;;  %vm1073_vm0 = vmmov (!%p714_p10), 0  }
  0x7a   : > { %731 = vmatpush3.bf16.msra.mxu0 %v865_v2  ;;  %v870_v7 = vld [vmem:[%s1278_s28 + $0x58] sm:$0xff]   ;;  %v872_v9 = vld [vmem:[%s1278_s28 + $0x60] sm:$0xff]   ;;  %v874_v11 = vld [vmem:[%s1278_s28 + $0x68] sm:$0xff]  }
  0x7b   : > { %732 = vmatprep.subr.bf16.mxu0 %v866_v3  ;;  %v871_v8 = vld [vmem:[%s1278_s28 + $0x18] sm:$0xff]   ;;  %v873_v10 = vld [vmem:[%s1278_s28 + $0x20] sm:$0xff]   ;;  %v875_v14 = vld [vmem:[%s1278_s28 + $0x28] sm:$0xff]  }
  0x7c   : > { %v286_v12 = vld [vmem:[%s1271_s7 + $0x8] sm:$0xff]  ;;  %v876_v15 = vld [vmem:[%s1278_s28 + $0x70] sm:$0xff]   ;;  %v880_v28 = vld [vmem:[#allocation8] sm:$0xff] (!%p714_p10)  }
  0x7d   : > { %v288_v13 = vpack.c.bf16 %v286_v12, %v286_v12  ;;  %v877_v16 = vld [vmem:[%s1278_s28 + $0x30] sm:$0xff]   ;;  %v878_v17 = vld [vmem:[%s1278_s28 + $0x78] sm:$0xff]   ;;  %v881_v30 = vld [vmem:[#allocation8 + $0x8] sm:$0xff] (!%p714_p10)  }
  0x7e   : > { %733 = vmatpush3.bf16.msra.mxu0 %v867_v4  ;;  %v879_v18 = vld [vmem:[%s1278_s28 + $0x38] sm:$0xff]   ;;  %v285_v19 = vld [vmem:[%s1271_s7] sm:$0xff]  ;;  %v885_v34 = vld [vmem:[#allocation8 + $0x28] sm:$0xff] (!%p714_p10)  }
  0x7f   : > { %734 = vmatprep.subr.bf16.mxu0 %v868_v5  ;;  %450 = vmatprep.mubr.bf16.mxu0 %v288_v13  ;;  %v287_v20 = vpack.c.bf16 %v285_v19, %v285_v19  ;;  %v289_v22 = vld [vmem:[#allocation2] sm:$0xff]  ;;  %v882_v31 = vld [vmem:[#allocation8 + $0x10] sm:$0xff] (!%p714_p10)   ;;  %v884_v33 = vld [vmem:[#allocation8 + $0x20] sm:$0xff] (!%p714_p10)  }
  0x80   : > { %v883_v32 = vld [vmem:[#allocation8 + $0x18] sm:$0xff] (!%p714_p10)   ;;  %v886_v35 = vld [vmem:[#allocation8 + $0x30] sm:$0xff] (!%p714_p10)  }
  0x81   : > { %v887_v36 = vld [vmem:[#allocation8 + $0x38] sm:$0xff] (!%p714_p10)  }
  0x82   : > { %735 = vmatpush3.bf16.msra.mxu0 %v869_v6  ;;  %v715_v39 = vld [vmem:[%s1355_s3] ss:$0 sm:$0xff] (!%p714_p10) }
  0x83   : > { %736 = vmatprep.subr.bf16.mxu0 %v870_v7 }
  0x86   : > { %737 = vmatpush3.bf16.msra.mxu0 %v871_v8 }
  0x87   : > { %738 = vmatprep.subr.bf16.mxu0 %v872_v9 }
  0x8a   : > { %739 = vmatpush3.bf16.msra.mxu0 %v873_v10 }
  0x8b   : > { %740 = vmatprep.subr.bf16.mxu0 %v874_v11 }
  0x8e   : > { %741 = vmatpush3.bf16.msra.mxu0 %v875_v14 }
  0x8f   : > { %742 = vmatprep.subr.bf16.mxu0 %v876_v15 }
  0x92   : > { %743 = vmatpush3.bf16.msra.mxu0 %v877_v16 }
  0x93   : > { %744 = vmatprep.subr.bf16.mxu0 %v878_v17 }
  0x96   : > { %745 = vmatpush3.bf16.msra.mxu0 %v879_v18 }
  0x97   : > { %761 = vmatprep.subr.bf16.mxu0 (!%p714_p10), %v1072_v29 }
  0x99   : > { %451 = vmatmul.mubr.bf16.vlgmr.msra.gmra.mrb[0].mxu0 %v287_v20 }
  0x9a   : > { %762 = vmatpush3.bf16.msra.mxu0 (!%p714_p10), %v880_v28  ;;  %777 = vmatprep.mubr.msk.bf16.mxu0 (!%p714_p10), %vm1073_vm0, %v1072_v29 }
  0x9b   : > { %763 = vmatprep.subr.bf16.mxu0 (!%p714_p10), %v1072_v29 }
  0x9e   : > { %764 = vmatpush3.bf16.msra.mxu0 (!%p714_p10), %v881_v30 }
  0x9f   : > { %765 = vmatprep.subr.bf16.mxu0 (!%p714_p10), %v1072_v29 }
  0xa2   : > { %766 = vmatpush3.bf16.msra.mxu0 (!%p714_p10), %v882_v31 }
  0xa3   : > { %767 = vmatprep.subr.bf16.mxu0 (!%p714_p10), %v1072_v29 }
  0xa6   : > { %768 = vmatpush3.bf16.msra.mxu0 (!%p714_p10), %v883_v32 }
  0xa7   : > { %769 = vmatprep.subr.bf16.mxu0 (!%p714_p10), %v1072_v29 }
  0xaa   : > { %770 = vmatpush3.bf16.msra.mxu0 (!%p714_p10), %v884_v33 }
  0xab   : > { %771 = vmatprep.subr.bf16.mxu0 (!%p714_p10), %v1072_v29 }
  0xae   : > { %772 = vmatpush3.bf16.msra.mxu0 (!%p714_p10), %v885_v34 }
  0xaf   : > { %773 = vmatprep.subr.bf16.mxu0 (!%p714_p10), %v1072_v29 }
  0xb2   : > { %774 = vmatpush3.bf16.msra.mxu0 (!%p714_p10), %v886_v35 }
  0xb3   : > { %775 = vmatprep.subr.bf16.mxu0 (!%p714_p10), %v1072_v29 }
  0xb6   : > { %776 = vmatpush3.bf16.msra.mxu0 (!%p714_p10), %v887_v36 }
 0x16c   : > { %v746_v21 = vpop.f32.mrb[0].mxu0  ;;  %463 = sbr.rel (%p714_p10) target bundleno = 595 (0x253), region = 56 }
 0x16d   : > { %v747_v23 = vpop.f32.mrb[1].mxu0 }
 0x16e   : > { %v748_v24 = vadd.f32 %v747_v23, %v746_v21  ;;  %v749_v25 = vpop.f32.mrb[2].mxu0 }
 0x16f   : > { %v750_v26 = vpop.f32.mrb[3].mxu0 }
 0x170   : > { %v458_v27 = vadd.f32 %v748_v24, %v289_v22 }
 0x172   : > { %459 = vst [vmem:[#allocation2] sm:$0xff] %v458_v27 }
 0x179   : > { %v464_v37 = vld [vmem:[#allocation2] sm:$0xff] }
 0x17a   : > { %v465_v38 = vpack.c.bf16 %v464_v37, %v464_v37 }
 0x17c   : > { %778 = vmatmul.mubr.bf16.vlgmr.msra.gmra.mrb[0].mxu0 %v465_v38 }
 0x24f   : > { %v571_v40 = vpop.f32.mrb[0].mxu0 }
 0x250   : > { %v572_v41 = vadd.f32 %v715_v39, %v571_v40  ;;  %v779_v42 = vpop.f32.mrb[1].mxu0 }
 0x251   : > { %v574_v43 = vpop.f32.mrb[2].mxu0 }
 0x252   : > { %577 = vst [vmem:[#allocation9] sm:$0xff] %v572_v41  ;;  %v780_v44 = vpop.f32.mrb[3].mxu0 }
 0x253 PF: > { %p807_p11 = scmp.eq.s32.totalorder %s1129_s21, 2  ;;  %s1074_s23 = smov [#allocation9]  }
 0x254   : > { %s587_s14 = sshll.u32 %s1074_s23, 4  ;;  %s588_s14 = int_to_ptr.vmem [resolvable:$true] %s587_s14 }
 0x255   : > { %s976_s15 = scalar_lea.vmem %s588_s14, 128  ;;  %p983_p0 = scmp.lt.s32.totalorder %s588_s14, %s588_s14 }
 0x256   : > { %p977_p13 = scmp.ne.s32.totalorder %s588_s14, %s976_s15  ;;  %p984_p6 = scmp.lt.s32.totalorder %s976_s15, %s976_s15 }
 0x258   : > { %p978_p2 = pnand %p977_p13, %p807_p11  ;;  %p985_p4 = por %p984_p6, %p983_p0 }
 0x25a   : > { %p979_p3 = pneg %p978_p2 }
 0x25c   : > { %p986_p5 = pnand %p985_p4, %p979_p3 }
 0x25e   : > { %989 = shalt.err (!%p986_p5)
}
 0x25f   : > { %s990_s26 = scalar_lea.hbm %s1356_s4, 128 }
 0x260   : > { %p991_p12 = scmp.ne.s32.totalorder %s1356_s4, %s990_s26  ;;  %p996_p8 = scmp.lt.u32.totalorder %s990_s26, %s1356_s4 }
 0x262   : > { %p992_p1 = pnand %p991_p12, %p807_p11 }
 0x264   : > { %p993_p7 = pneg %p992_p1 }
 0x266   : > { %p998_p9 = pnand %p996_p8, %p993_p7 }
 0x268   : > { %1001 = shalt.err (!%p998_p9)
}
 0x269   : > { %790 = dma.vmem_to_hbm [thread:$0]  (%p807_p11), %s588_s14, 128, %s1356_s4, [#allocation5]  }
 0x26a   : > { %1039 = dma.done.wait (%p807_p11), [#allocation5], 128  }
 0x26b   : > { %1041 = vsyncadd (%p807_p11), [#allocation5], 4294967168 }
 0x26c PF: > { %s21_s20 = sadd.s32 1, %s1064_s20   ;;  %s1370_s15 = smov %s1048_s16 }
 0x26d   : > { %p18_p10 = scmp.ge.s32.totalorder %s21_s20, 5   ;;  %s1371_s16 = smov %s1052_s17 }
 0x26e   : > { %s1372_s17 = smov %s1188_s29  ;;  %s1373_s18 = smov %s1060_s19 }
 0x26f   : > { %s1374_s19 = smov %s1376_s27  ;;  %20 = sbr.rel (!%p18_p10) target bundleno = 7 (0x7), region = 99 }
 0x276   :  { %600 = vsyncpa [#allocation4], 1 }
 0x277   :  { %602 = vsyncpa [#allocation4 + $0x1], 1 }
 0x278   :  { %603 = vsyncpa [#allocation7], 1 }
 0x279   :  { %605 = vsyncpa [#allocation7 + $0x1], 1 }
 0x27a   :  { %606 = vsyncpa [#allocation5], 1 }
 0x27b   :  { %608 = vsyncpa [#allocation5 + $0x1], 1 }

</bundles_post_ra>
